<compile_context>
chip_gen: v7x
topology: tpu7x:2x2x1
jax: 0.10.0
libtpu: 0.0.40
codegen_flags: <defaults>
</compile_context>

<pallas_src>
import functools
import math

import jax
import jax.numpy as jnp
from jax.experimental import pallas as pl
from jax.experimental.pallas import tpu as pltpu


LANE = 128       # last-dim alignment (vreg lanes)
SUBLANE = 8      # second-to-last-dim alignment (vreg sublanes)


def _round_up(n, m):
    return (n + m - 1) // m * m


# ----------------------------------------------------------------------------
# Generation-aware VMEM budgets / tile caps
# ----------------------------------------------------------------------------
def _vmem_capacity_bytes():
    try:
        info = pltpu.get_tpu_info()
        cap = getattr(info, "vmem_capacity_bytes", None)
        if cap:
            return int(cap)
    except Exception:
        pass
    return 64 * 1024 * 1024            # conservative fallback (v7x-sized)


_VMEM_CAPACITY = _vmem_capacity_bytes()

# Scoped-VMEM limit requested from Mosaic on every pallas_call:
#   128 MiB parts (v5e/v6e) -> 96 MiB, 64 MiB part (v7x) -> 48 MiB.
VMEM_LIMIT = min(_VMEM_CAPACITY * 3 // 4, 96 * 1024 * 1024)

# The fused-path estimate below already includes 2x double-buffering, so the
# budget is the requested limit minus a small compiler-scratch headroom.
FUSED_VMEM_BUDGET = VMEM_LIMIT - 4 * 1024 * 1024

# Tiled-path tile caps (bigger VMEM -> bigger weight tiles / fewer K steps).
if _VMEM_CAPACITY >= 100 * 1024 * 1024:        # v5e / v6e (128 MiB VMEM)
    _TN_CAP, _TK_CAP = 1024, 2048
else:                                          # v7x (64 MiB per TensorCore)
    _TN_CAP, _TK_CAP = 512, 2048
_TM_CAP = 256


# ----------------------------------------------------------------------------
# Shared activation epilogue (always computed in fp32)
# ----------------------------------------------------------------------------
def _apply_act(y, act):
    if act == "relu":
        return jnp.maximum(y, 0.0)
    if act == "tanh":
        return jnp.tanh(y)
    if act == "sigmoid":
        # exp on the EUP + approximate reciprocal on the EUP (otherwise-idle
        # slots); clip enforces the mathematically guaranteed [0, 1] range.
        return jnp.clip(pl.reciprocal(1.0 + jnp.exp(-y), approx=True), 0.0, 1.0)
    if act == "none":
        return y
    raise ValueError(f"unknown activation {act!r}")


# ----------------------------------------------------------------------------
# Fully fused whole-GAN kernel: dgz = D(G(z)) in ONE pallas_call.
# The generated image stays VMEM/vreg-resident between the two networks and
# is written to HBM exactly once (as an output), never read back.
# ----------------------------------------------------------------------------
def _fused_gan_kernel(*refs, n_gen, gen_acts, disc_acts):
    # refs = (z, gw0, gb0, ..., dw0, db0, ..., img_out, dgz_out)
    z_ref = refs[0]
    img_ref, dgz_ref = refs[-2], refs[-1]
    wb = refs[1:-2]

    def layer(h, idx, act):
        w = wb[2 * idx][...]                                   # bf16 (Kp, Np)
        b = wb[2 * idx + 1][...]                               # f32  (1, Np)
        y = jnp.dot(h, w, preferred_element_type=jnp.float32) + b
        return _apply_act(y, act)

    h = z_ref[...]                                             # bf16
    for li in range(n_gen):
        y = layer(h, li, gen_acts[li])
        h = y.astype(jnp.bfloat16)                             # stays in VMEM
    img_ref[...] = y.astype(img_ref.dtype)                     # fake image out

    for li in range(len(disc_acts)):
        y = layer(h, n_gen + li, disc_acts[li])
        h = y.astype(jnp.bfloat16)
    dgz_ref[...] = y.astype(dgz_ref.dtype)                     # D(G(z)) out


def _fused_gan(gen_padded, disc_padded, z, output_shape):
    B, D = z.shape
    Bp = max(SUBLANE, _round_up(B, SUBLANE))
    D0p = gen_padded[0][0].shape[0]
    z_pad = jnp.zeros((Bp, D0p), jnp.float32).at[:B, :D].set(z)
    z_pad = z_pad.astype(jnp.bfloat16)

    img_dim_p = gen_padded[-1][0].shape[1]
    dgz_dim_p = disc_padded[-1][0].shape[1]

    operands = [z_pad]
    in_specs = [pl.BlockSpec(z_pad.shape, lambda *_: (0, 0))]
    for w, b in list(gen_padded) + list(disc_padded):
        operands += [w, b]
        in_specs += [pl.BlockSpec(w.shape, lambda *_: (0, 0)),
                     pl.BlockSpec(b.shape, lambda *_: (0, 0))]

    gen_acts = tuple(["relu"] * (len(gen_padded) - 1) + ["tanh"])
    disc_acts = tuple(["relu"] * (len(disc_padded) - 1) + ["sigmoid"])

    img, dgz = pl.pallas_call(
        functools.partial(_fused_gan_kernel, n_gen=len(gen_padded),
                          gen_acts=gen_acts, disc_acts=disc_acts),
        out_shape=(jax.ShapeDtypeStruct((Bp, img_dim_p), jnp.float32),
                   jax.ShapeDtypeStruct((Bp, dgz_dim_p), jnp.float32)),
        grid=(1,),
        in_specs=in_specs,
        out_specs=(pl.BlockSpec((Bp, img_dim_p), lambda *_: (0, 0)),
                   pl.BlockSpec((Bp, dgz_dim_p), lambda *_: (0, 0))),
        compiler_params=pltpu.CompilerParams(
            dimension_semantics=("arbitrary",),
            vmem_limit_bytes=VMEM_LIMIT),
    )(*operands)

    img_len = math.prod(output_shape)
    fake_imgs = img[:B, :img_len].reshape(B, *output_shape)
    return fake_imgs, dgz[:B, :1]


# ----------------------------------------------------------------------------
# Fused single-MLP kernel (all layers in one pallas_call)
# ----------------------------------------------------------------------------
def _fused_mlp_kernel(*refs, acts):
    x_ref, o_ref = refs[0], refs[-1]
    wb = refs[1:-1]
    h = x_ref[...]
    n_layers = len(acts)
    for li in range(n_layers):
        w = wb[2 * li][...]
        b = wb[2 * li + 1][...]
        y = jnp.dot(h, w, preferred_element_type=jnp.float32) + b
        y = _apply_act(y, acts[li])
        if li + 1 < n_layers:
            h = y.astype(jnp.bfloat16)
        else:
            o_ref[...] = y.astype(o_ref.dtype)


def _fused_mlp(x_pad, padded_params, acts):
    Bp, _ = x_pad.shape
    out_dim = padded_params[-1][0].shape[1]
    operands = [x_pad]
    in_specs = [pl.BlockSpec(x_pad.shape, lambda *_: (0, 0))]
    for w, b in padded_params:
        operands += [w, b]
        in_specs += [pl.BlockSpec(w.shape, lambda *_: (0, 0)),
                     pl.BlockSpec(b.shape, lambda *_: (0, 0))]
    return pl.pallas_call(
        functools.partial(_fused_mlp_kernel, acts=tuple(acts)),
        out_shape=jax.ShapeDtypeStruct((Bp, out_dim), jnp.float32),
        grid=(1,),
        in_specs=in_specs,
        out_specs=pl.BlockSpec((Bp, out_dim), lambda *_: (0, 0)),
        compiler_params=pltpu.CompilerParams(
            dimension_semantics=("arbitrary",),
            vmem_limit_bytes=VMEM_LIMIT),
    )(*operands)


def _fused_vmem_estimate(Bp, padded_params, out_dims_padded):
    """Resident-VMEM estimate for the fused path.

    Conservative: assumes Pallas double-buffers every input/output BlockSpec
    (even for grid=(1,)) and counts the peak fp32+bf16 intermediate
    activations the compiler materializes between layers.
    """
    bytes_ = 2 * Bp * padded_params[0][0].shape[0] * 2            # x (bf16)
    max_n = 0
    for w, b in padded_params:
        bytes_ += 2 * (w.size * 2 + b.size * 4)                   # bf16 w, f32 b
        max_n = max(max_n, w.shape[1])
    for n in out_dims_padded:
        bytes_ += 2 * Bp * n * 4                                  # f32 outputs
    bytes_ += 2 * Bp * max_n * 4 + Bp * max_n * 2                 # activations
    return bytes_


# ----------------------------------------------------------------------------
# Tiled Linear(+act) kernel for production-size layers (K-axis accumulator)
# ----------------------------------------------------------------------------
def _tiled_linear_kernel(x_ref, w_ref, b_ref, o_ref, acc_ref, *, act):
    k = pl.program_id(2)

    @pl.when(k == 0)
    def _():
        acc_ref[...] = jnp.zeros_like(acc_ref)

    acc_ref[...] += jnp.dot(x_ref[...], w_ref[...],
                            preferred_element_type=jnp.float32)

    @pl.when(k == pl.num_programs(2) - 1)
    def _():
        # Bias broadcast + activation only once, on the final K step (fp32).
        # (The (1, tn) bias tile is re-DMA'd per K step; ~1 KB/step, accepted.)
        y = _apply_act(acc_ref[...] + b_ref[...], act)
        o_ref[...] = y.astype(o_ref.dtype)


def _pick_tile(dim, cap):
    """Largest multiple of LANE <= cap that divides dim (dim is 128-aligned)."""
    best = None
    t = LANE
    lim = min(cap, dim)
    while t <= lim:
        if dim % t == 0:
            best = t
        t += LANE
    return best if best is not None else dim


def _tiled_linear(x_pad, w_pad, b_pad, act, out_dtype):
    Mp, Kp = x_pad.shape
    _, Np = w_pad.shape

    if Mp % LANE == 0:
        tm = _pick_tile(Mp, _TM_CAP)
    else:
        tm = Mp                                  # small batch: one M block
    tn = _pick_tile(Np, _TN_CAP)
    tk = _pick_tile(Kp, _TK_CAP)

    # Megacore: if the M grid collapses to one step (small batch) make sure
    # the N grid still has >= 2 steps so both v7x TensorCores get work.
    if Mp // tm == 1 and Np // tn < 2 and Np >= 2 * LANE:
        tn = _pick_tile(Np, max(LANE, tn // 2))

    grid = (Mp // tm, Np // tn, Kp // tk)
    return pl.pallas_call(
        functools.partial(_tiled_linear_kernel, act=act),
        out_shape=jax.ShapeDtypeStruct((Mp, Np), out_dtype),
        grid=grid,
        in_specs=[
            pl.BlockSpec((tm, tk), lambda i, j, k: (i, k)),
            pl.BlockSpec((tk, tn), lambda i, j, k: (k, j)),
            pl.BlockSpec((1, tn), lambda i, j, k: (0, j)),
        ],
        out_specs=pl.BlockSpec((tm, tn), lambda i, j, k: (i, j)),
        scratch_shapes=[pltpu.VMEM((tm, tn), jnp.float32)],
        compiler_params=pltpu.CompilerParams(
            dimension_semantics=("parallel", "parallel", "arbitrary"),
            vmem_limit_bytes=VMEM_LIMIT),
    )(x_pad, w_pad, b_pad)


# ----------------------------------------------------------------------------
# Parameter init (PyTorch nn.Linear default: U(-1/sqrt(in), 1/sqrt(in)))
# and 128-lane padding (weights -> bf16, biases stay f32)
# ----------------------------------------------------------------------------
def init_linear(key, fan_in, fan_out):
    kw, kb = jax.random.split(key)
    bound = 1.0 / jnp.sqrt(jnp.float32(fan_in))
    w = jax.random.uniform(kw, (fan_in, fan_out), jnp.float32, -bound, bound)
    b = jax.random.uniform(kb, (fan_out,), jnp.float32, -bound, bound)
    return w, b


def init_mlp(key, sizes):
    keys = jax.random.split(key, len(sizes) - 1)
    return [init_linear(k, fi, fo)
            for k, (fi, fo) in zip(keys, zip(sizes[:-1], sizes[1:]))]


def pad_mlp_params(params):
    padded = []
    for w, b in params:
        fi, fo = w.shape
        fip, fop = _round_up(fi, LANE), _round_up(fo, LANE)
        wp = jnp.zeros((fip, fop), jnp.float32).at[:fi, :fo].set(w)
        wp = wp.astype(jnp.bfloat16)
        bp = jnp.zeros((1, fop), jnp.float32).at[0, :fo].set(b)
        padded.append((wp, bp))
    return padded


# ----------------------------------------------------------------------------
# MLP forward dispatcher (fused if VMEM-resident, else per-layer tiled)
# ----------------------------------------------------------------------------
def mlp_forward(x, padded_params, acts, out_dim, *, force_tiled=False):
    """x: (B, D_in) f32 -> (B, out_dim) f32 through the padded bf16 MLP."""
    B, D = x.shape
    D0p = padded_params[0][0].shape[0]
    out_dim_p = padded_params[-1][0].shape[1]

    Bp_small = max(SUBLANE, _round_up(B, SUBLANE))
    est = _fused_vmem_estimate(Bp_small, padded_params, [out_dim_p])
    use_fused = (not force_tiled) and est <= FUSED_VMEM_BUDGET

    if use_fused:
        Bp = Bp_small
    else:
        # Tiled path: lane-pad the batch when large so the M grid tiles.
        Bp = _round_up(B, LANE) if B >= 64 else Bp_small

    x_pad = jnp.zeros((Bp, D0p), jnp.float32).at[:B, :D].set(x)
    x_pad = x_pad.astype(jnp.bfloat16)

    if use_fused:
        out = _fused_mlp(x_pad, padded_params, acts)
    else:
        # TODO(synk): for models just above the fused budget, stream weights
        # (memory_space=pl.ANY + manual double-buffered DMA) instead of
        # dropping to per-layer tiled matmuls.
        h = x_pad
        n = len(padded_params)
        for li, (w, b) in enumerate(padded_params):
            last = li == n - 1
            h = _tiled_linear(h, w, b, acts[li],
                              jnp.float32 if last else jnp.bfloat16)
        out = h
    return out[:B, :out_dim]


def generator_forward(gen_padded, z, output_shape, *, force_tiled=False):
    out_len = math.prod(output_shape)
    acts = ["relu"] * (len(gen_padded) - 1) + ["tanh"]
    y = mlp_forward(z, gen_padded, acts, out_len, force_tiled=force_tiled)
    return y.reshape(-1, *output_shape)


def discriminator_forward(disc_padded, x, *, force_tiled=False):
    B = x.shape[0]
    h = x.reshape(B, -1)                              # x.view(-1, input_length)
    acts = ["relu"] * (len(disc_padded) - 1) + ["sigmoid"]
    return mlp_forward(h, disc_padded, acts, 1,
                       force_tiled=force_tiled).reshape(-1, 1)


def gan_forward(gen_padded, disc_padded, z, output_shape):
    """Fused D(G(z)): one kernel when everything fits in VMEM, else two."""
    B, _ = z.shape
    Bp = max(SUBLANE, _round_up(B, SUBLANE))
    all_params = list(gen_padded) + list(disc_padded)
    out_dims = [gen_padded[-1][0].shape[1], disc_padded[-1][0].shape[1]]
    if _fused_vmem_estimate(Bp, all_params, out_dims) <= FUSED_VMEM_BUDGET:
        return _fused_gan(gen_padded, disc_padded, z, output_shape)
    fake = generator_forward(gen_padded, z, output_shape)
    return fake, discriminator_forward(disc_padded, fake)


# ----------------------------------------------------------------------------
# Pure-JAX reference (same padded bf16 weights, fp32 accumulation)
# ----------------------------------------------------------------------------
def mlp_reference(x, padded_params, acts, out_dim):
    B, D = x.shape
    D0p = padded_params[0][0].shape[0]
    h = jnp.zeros((B, D0p), jnp.float32).at[:, :D].set(x).astype(jnp.bfloat16)
    n = len(padded_params)
    for li, (w, b) in enumerate(padded_params):
        y = jnp.dot(h, w, preferred_element_type=jnp.float32) + b
        a = acts[li]
        if a == "relu":
            y = jnp.maximum(y, 0.0)
        elif a == "tanh":
            y = jnp.tanh(y)
        elif a == "sigmoid":
            y = 1.0 / (1.0 + jnp.exp(-y))
        h = y if li == n - 1 else y.astype(jnp.bfloat16)
    return h[:, :out_dim]


# ----------------------------------------------------------------------------
# Main
# ----------------------------------------------------------------------------
if __name__ == "__main__":
    key = jax.random.PRNGKey(0)
    k_gen, k_disc, k_z = jax.random.split(key, 3)

    # Small, structure-preserving stand-ins for the original configuration
    # (img_shape images, latent 100, gen [200, 3000, 10000], disc reversed).
    batch = 2
    img_shape = (1, 8, 8)                  # (C, H, W) -> flattened length 64
    img_len = math.prod(img_shape)
    latent = 100
    gen_layer_sizes = [32, 64, 128]
    disc_layer_sizes = [128, 64, 32]

    gen_params = init_mlp(k_gen, [latent] + gen_layer_sizes + [img_len])
    disc_params = init_mlp(k_disc, [img_len] + disc_layer_sizes + [1])
    gen_padded = pad_mlp_params(gen_params)
    disc_padded = pad_mlp_params(disc_params)

    # create_samples: z ~ U(-1, 1)
    z = jax.random.uniform(k_z, (batch, latent), jnp.float32, -1.0, 1.0)

    # Fully fused D(G(z)): one kernel launch, the generated image never makes
    # an HBM round trip between the generator and the discriminator.
    fake_imgs, dgz = gan_forward(gen_padded, disc_padded, z, img_shape)
    fake_imgs = jax.block_until_ready(fake_imgs)
    dgz = jax.block_until_ready(dgz)

    assert fake_imgs.shape == (batch, *img_shape)
    assert dgz.shape == (batch, 1)
    assert bool(jnp.all(jnp.isfinite(fake_imgs)))
    assert bool(jnp.all((fake_imgs >= -1.0) & (fake_imgs <= 1.0)))
    assert bool(jnp.all((dgz >= 0.0) & (dgz <= 1.0)))

    # Validate the fused pipeline against a pure-JAX reference on identical
    # padded bf16 weights.
    gen_acts = ["relu"] * (len(gen_padded) - 1) + ["tanh"]
    disc_acts = ["relu"] * (len(disc_padded) - 1) + ["sigmoid"]
    ref_fake = mlp_reference(z, gen_padded, gen_acts, img_len)
    ref_fake = ref_fake.reshape(batch, *img_shape)
    ref_dgz = mlp_reference(fake_imgs.reshape(batch, -1),
                            disc_padded, disc_acts, 1)
    assert bool(jnp.allclose(fake_imgs, ref_fake, atol=5e-2, rtol=5e-2))
    assert bool(jnp.allclose(dgz, ref_dgz.reshape(-1, 1), atol=5e-2, rtol=5e-2))

    # Separate generator / discriminator calls (each one fused kernel) must
    # agree with the fully fused pipeline.
    fake2 = generator_forward(gen_padded, z, img_shape)
    dgz2 = discriminator_forward(disc_padded, fake2)
    fake2 = jax.block_until_ready(fake2)
    dgz2 = jax.block_until_ready(dgz2)
    assert bool(jnp.allclose(fake2, fake_imgs, atol=5e-2, rtol=5e-2))
    assert bool(jnp.allclose(dgz2, dgz, atol=5e-2, rtol=5e-2))

    # Exercise the production (K-accumulator tiled) path as well and check it
    # agrees with the fused path.
    dgz_tiled = discriminator_forward(disc_padded, fake_imgs, force_tiled=True)
    dgz_tiled = jax.block_until_ready(dgz_tiled)
    assert bool(jnp.allclose(dgz, dgz_tiled, atol=2e-2, rtol=2e-2))

    print("KERNEL_OK")
</pallas_src>

<mosaic_0001>
module attributes {stable_mosaic.version = 11 : i64} {
  func.func @_fused_gan_kernel(%arg0: i32, %arg1: memref<8x128xbf16, #tpu.memory_space<vmem>>, %arg2: memref<128x128xbf16, #tpu.memory_space<vmem>>, %arg3: memref<1x128xf32, #tpu.memory_space<vmem>>, %arg4: memref<128x128xbf16, #tpu.memory_space<vmem>>, %arg5: memref<1x128xf32, #tpu.memory_space<vmem>>, %arg6: memref<128x128xbf16, #tpu.memory_space<vmem>>, %arg7: memref<1x128xf32, #tpu.memory_space<vmem>>, %arg8: memref<128x128xbf16, #tpu.memory_space<vmem>>, %arg9: memref<1x128xf32, #tpu.memory_space<vmem>>, %arg10: memref<128x128xbf16, #tpu.memory_space<vmem>>, %arg11: memref<1x128xf32, #tpu.memory_space<vmem>>, %arg12: memref<128x128xbf16, #tpu.memory_space<vmem>>, %arg13: memref<1x128xf32, #tpu.memory_space<vmem>>, %arg14: memref<128x128xbf16, #tpu.memory_space<vmem>>, %arg15: memref<1x128xf32, #tpu.memory_space<vmem>>, %arg16: memref<128x128xbf16, #tpu.memory_space<vmem>>, %arg17: memref<1x128xf32, #tpu.memory_space<vmem>>, %arg18: memref<8x128xf32, #tpu.memory_space<vmem>>, %arg19: memref<8x128xf32, #tpu.memory_space<vmem>>) attributes {dimension_semantics = [#tpu.dimension_semantics<arbitrary>], iteration_bounds = array<i64: 1>, scalar_prefetch = 0 : i64, scratch_operands = 0 : i64, tpu.core_type = #tpu.core_type<tc>, window_params = [{pipeline_mode = #tpu.pipeline_mode<synchronous>, transform_indices = @transform_0, window_bounds = array<i64: 8, 128>}, {pipeline_mode = #tpu.pipeline_mode<synchronous>, transform_indices = @transform_1, window_bounds = array<i64: 128, 128>}, {pipeline_mode = #tpu.pipeline_mode<synchronous>, transform_indices = @transform_2, window_bounds = array<i64: 1, 128>}, {pipeline_mode = #tpu.pipeline_mode<synchronous>, transform_indices = @transform_3, window_bounds = array<i64: 128, 128>}, {pipeline_mode = #tpu.pipeline_mode<synchronous>, transform_indices = @transform_4, window_bounds = array<i64: 1, 128>}, {pipeline_mode = #tpu.pipeline_mode<synchronous>, transform_indices = @transform_5, window_bounds = array<i64: 128, 128>}, {pipeline_mode = #tpu.pipeline_mode<synchronous>, transform_indices = @transform_6, window_bounds = array<i64: 1, 128>}, {pipeline_mode = #tpu.pipeline_mode<synchronous>, transform_indices = @transform_7, window_bounds = array<i64: 128, 128>}, {pipeline_mode = #tpu.pipeline_mode<synchronous>, transform_indices = @transform_8, window_bounds = array<i64: 1, 128>}, {pipeline_mode = #tpu.pipeline_mode<synchronous>, transform_indices = @transform_9, window_bounds = array<i64: 128, 128>}, {pipeline_mode = #tpu.pipeline_mode<synchronous>, transform_indices = @transform_10, window_bounds = array<i64: 1, 128>}, {pipeline_mode = #tpu.pipeline_mode<synchronous>, transform_indices = @transform_11, window_bounds = array<i64: 128, 128>}, {pipeline_mode = #tpu.pipeline_mode<synchronous>, transform_indices = @transform_12, window_bounds = array<i64: 1, 128>}, {pipeline_mode = #tpu.pipeline_mode<synchronous>, transform_indices = @transform_13, window_bounds = array<i64: 128, 128>}, {pipeline_mode = #tpu.pipeline_mode<synchronous>, transform_indices = @transform_14, window_bounds = array<i64: 1, 128>}, {pipeline_mode = #tpu.pipeline_mode<synchronous>, transform_indices = @transform_15, window_bounds = array<i64: 128, 128>}, {pipeline_mode = #tpu.pipeline_mode<synchronous>, transform_indices = @transform_16, window_bounds = array<i64: 1, 128>}, {pipeline_mode = #tpu.pipeline_mode<synchronous>, transform_indices = @transform_17, window_bounds = array<i64: 8, 128>}, {pipeline_mode = #tpu.pipeline_mode<synchronous>, transform_indices = @transform_18, window_bounds = array<i64: 8, 128>}]} {
    %c0 = arith.constant 0 : index
    %c0_0 = arith.constant 0 : index
    %0 = vector.load %arg1[%c0, %c0_0] : memref<8x128xbf16, #tpu.memory_space<vmem>>, vector<8x128xbf16>
    %c0_1 = arith.constant 0 : index
    %c0_2 = arith.constant 0 : index
    %1 = vector.load %arg2[%c0_1, %c0_2] : memref<128x128xbf16, #tpu.memory_space<vmem>>, vector<128x128xbf16>
    %c0_3 = arith.constant 0 : index
    %c0_4 = arith.constant 0 : index
    %2 = vector.load %arg3[%c0_3, %c0_4] : memref<1x128xf32, #tpu.memory_space<vmem>>, vector<1x128xf32>
    %cst = arith.constant dense<0.000000e+00> : vector<8x128xf32>
    %3 = tpu.matmul %0, %1, %cst {dimension_numbers = #tpu.dot_dimension_numbers<[1], [0], [0], [1], [0, 0, 1, 1], [], []>} : vector<8x128xbf16>, vector<128x128xbf16>, vector<8x128xf32> -> vector<8x128xf32>
    %4 = vector.broadcast %2 : vector<1x128xf32> to vector<8x128xf32>
    %5 = arith.addf %3, %4 : vector<8x128xf32>
    %cst_5 = arith.constant 0.000000e+00 : f32
    %6 = vector.broadcast %cst_5 : f32 to vector<8x128xf32>
    %7 = arith.maximumf %5, %6 : vector<8x128xf32>
    %8 = arith.truncf %7 : vector<8x128xf32> to vector<8x128xbf16>
    %c0_6 = arith.constant 0 : index
    %c0_7 = arith.constant 0 : index
    %9 = vector.load %arg4[%c0_6, %c0_7] : memref<128x128xbf16, #tpu.memory_space<vmem>>, vector<128x128xbf16>
    %c0_8 = arith.constant 0 : index
    %c0_9 = arith.constant 0 : index
    %10 = vector.load %arg5[%c0_8, %c0_9] : memref<1x128xf32, #tpu.memory_space<vmem>>, vector<1x128xf32>
    %cst_10 = arith.constant dense<0.000000e+00> : vector<8x128xf32>
    %11 = tpu.matmul %8, %9, %cst_10 {dimension_numbers = #tpu.dot_dimension_numbers<[1], [0], [0], [1], [0, 0, 1, 1], [], []>} : vector<8x128xbf16>, vector<128x128xbf16>, vector<8x128xf32> -> vector<8x128xf32>
    %12 = vector.broadcast %10 : vector<1x128xf32> to vector<8x128xf32>
    %13 = arith.addf %11, %12 : vector<8x128xf32>
    %cst_11 = arith.constant 0.000000e+00 : f32
    %14 = vector.broadcast %cst_11 : f32 to vector<8x128xf32>
    %15 = arith.maximumf %13, %14 : vector<8x128xf32>
    %16 = arith.truncf %15 : vector<8x128xf32> to vector<8x128xbf16>
    %c0_12 = arith.constant 0 : index
    %c0_13 = arith.constant 0 : index
    %17 = vector.load %arg6[%c0_12, %c0_13] : memref<128x128xbf16, #tpu.memory_space<vmem>>, vector<128x128xbf16>
    %c0_14 = arith.constant 0 : index
    %c0_15 = arith.constant 0 : index
    %18 = vector.load %arg7[%c0_14, %c0_15] : memref<1x128xf32, #tpu.memory_space<vmem>>, vector<1x128xf32>
    %cst_16 = arith.constant dense<0.000000e+00> : vector<8x128xf32>
    %19 = tpu.matmul %16, %17, %cst_16 {dimension_numbers = #tpu.dot_dimension_numbers<[1], [0], [0], [1], [0, 0, 1, 1], [], []>} : vector<8x128xbf16>, vector<128x128xbf16>, vector<8x128xf32> -> vector<8x128xf32>
    %20 = vector.broadcast %18 : vector<1x128xf32> to vector<8x128xf32>
    %21 = arith.addf %19, %20 : vector<8x128xf32>
    %cst_17 = arith.constant 0.000000e+00 : f32
    %22 = vector.broadcast %cst_17 : f32 to vector<8x128xf32>
    %23 = arith.maximumf %21, %22 : vector<8x128xf32>
    %24 = arith.truncf %23 : vector<8x128xf32> to vector<8x128xbf16>
    %c0_18 = arith.constant 0 : index
    %c0_19 = arith.constant 0 : index
    %25 = vector.load %arg8[%c0_18, %c0_19] : memref<128x128xbf16, #tpu.memory_space<vmem>>, vector<128x128xbf16>
    %c0_20 = arith.constant 0 : index
    %c0_21 = arith.constant 0 : index
    %26 = vector.load %arg9[%c0_20, %c0_21] : memref<1x128xf32, #tpu.memory_space<vmem>>, vector<1x128xf32>
    %cst_22 = arith.constant dense<0.000000e+00> : vector<8x128xf32>
    %27 = tpu.matmul %24, %25, %cst_22 {dimension_numbers = #tpu.dot_dimension_numbers<[1], [0], [0], [1], [0, 0, 1, 1], [], []>} : vector<8x128xbf16>, vector<128x128xbf16>, vector<8x128xf32> -> vector<8x128xf32>
    %28 = vector.broadcast %26 : vector<1x128xf32> to vector<8x128xf32>
    %29 = arith.addf %27, %28 : vector<8x128xf32>
    %30 = math.tanh %29 : vector<8x128xf32>
    %31 = arith.truncf %30 : vector<8x128xf32> to vector<8x128xbf16>
    %c0_23 = arith.constant 0 : index
    %c0_24 = arith.constant 0 : index
    %32 = vector.load %arg18[%c0_23, %c0_24] : memref<8x128xf32, #tpu.memory_space<vmem>>, vector<8x128xf32>
    tpu.vector_store %arg18[%c0_23, %c0_24], %30 {strides = array<i32>} : memref<8x128xf32, #tpu.memory_space<vmem>>, vector<8x128xf32>,
    %c0_25 = arith.constant 0 : index
    %c0_26 = arith.constant 0 : index
    %33 = vector.load %arg10[%c0_25, %c0_26] : memref<128x128xbf16, #tpu.memory_space<vmem>>, vector<128x128xbf16>
    %c0_27 = arith.constant 0 : index
    %c0_28 = arith.constant 0 : index
    %34 = vector.load %arg11[%c0_27, %c0_28] : memref<1x128xf32, #tpu.memory_space<vmem>>, vector<1x128xf32>
    %cst_29 = arith.constant dense<0.000000e+00> : vector<8x128xf32>
    %35 = tpu.matmul %31, %33, %cst_29 {dimension_numbers = #tpu.dot_dimension_numbers<[1], [0], [0], [1], [0, 0, 1, 1], [], []>} : vector<8x128xbf16>, vector<128x128xbf16>, vector<8x128xf32> -> vector<8x128xf32>
    %36 = vector.broadcast %34 : vector<1x128xf32> to vector<8x128xf32>
    %37 = arith.addf %35, %36 : vector<8x128xf32>
    %cst_30 = arith.constant 0.000000e+00 : f32
    %38 = vector.broadcast %cst_30 : f32 to vector<8x128xf32>
    %39 = arith.maximumf %37, %38 : vector<8x128xf32>
    %40 = arith.truncf %39 : vector<8x128xf32> to vector<8x128xbf16>
    %c0_31 = arith.constant 0 : index
    %c0_32 = arith.constant 0 : index
    %41 = vector.load %arg12[%c0_31, %c0_32] : memref<128x128xbf16, #tpu.memory_space<vmem>>, vector<128x128xbf16>
    %c0_33 = arith.constant 0 : index
    %c0_34 = arith.constant 0 : index
    %42 = vector.load %arg13[%c0_33, %c0_34] : memref<1x128xf32, #tpu.memory_space<vmem>>, vector<1x128xf32>
    %cst_35 = arith.constant dense<0.000000e+00> : vector<8x128xf32>
    %43 = tpu.matmul %40, %41, %cst_35 {dimension_numbers = #tpu.dot_dimension_numbers<[1], [0], [0], [1], [0, 0, 1, 1], [], []>} : vector<8x128xbf16>, vector<128x128xbf16>, vector<8x128xf32> -> vector<8x128xf32>
    %44 = vector.broadcast %42 : vector<1x128xf32> to vector<8x128xf32>
    %45 = arith.addf %43, %44 : vector<8x128xf32>
    %cst_36 = arith.constant 0.000000e+00 : f32
    %46 = vector.broadcast %cst_36 : f32 to vector<8x128xf32>
    %47 = arith.maximumf %45, %46 : vector<8x128xf32>
    %48 = arith.truncf %47 : vector<8x128xf32> to vector<8x128xbf16>
    %c0_37 = arith.constant 0 : index
    %c0_38 = arith.constant 0 : index
    %49 = vector.load %arg14[%c0_37, %c0_38] : memref<128x128xbf16, #tpu.memory_space<vmem>>, vector<128x128xbf16>
    %c0_39 = arith.constant 0 : index
    %c0_40 = arith.constant 0 : index
    %50 = vector.load %arg15[%c0_39, %c0_40] : memref<1x128xf32, #tpu.memory_space<vmem>>, vector<1x128xf32>
    %cst_41 = arith.constant dense<0.000000e+00> : vector<8x128xf32>
    %51 = tpu.matmul %48, %49, %cst_41 {dimension_numbers = #tpu.dot_dimension_numbers<[1], [0], [0], [1], [0, 0, 1, 1], [], []>} : vector<8x128xbf16>, vector<128x128xbf16>, vector<8x128xf32> -> vector<8x128xf32>
    %52 = vector.broadcast %50 : vector<1x128xf32> to vector<8x128xf32>
    %53 = arith.addf %51, %52 : vector<8x128xf32>
    %cst_42 = arith.constant 0.000000e+00 : f32
    %54 = vector.broadcast %cst_42 : f32 to vector<8x128xf32>
    %55 = arith.maximumf %53, %54 : vector<8x128xf32>
    %56 = arith.truncf %55 : vector<8x128xf32> to vector<8x128xbf16>
    %c0_43 = arith.constant 0 : index
    %c0_44 = arith.constant 0 : index
    %57 = vector.load %arg16[%c0_43, %c0_44] : memref<128x128xbf16, #tpu.memory_space<vmem>>, vector<128x128xbf16>
    %c0_45 = arith.constant 0 : index
    %c0_46 = arith.constant 0 : index
    %58 = vector.load %arg17[%c0_45, %c0_46] : memref<1x128xf32, #tpu.memory_space<vmem>>, vector<1x128xf32>
    %cst_47 = arith.constant dense<0.000000e+00> : vector<8x128xf32>
    %59 = tpu.matmul %56, %57, %cst_47 {dimension_numbers = #tpu.dot_dimension_numbers<[1], [0], [0], [1], [0, 0, 1, 1], [], []>} : vector<8x128xbf16>, vector<128x128xbf16>, vector<8x128xf32> -> vector<8x128xf32>
    %60 = vector.broadcast %58 : vector<1x128xf32> to vector<8x128xf32>
    %61 = arith.addf %59, %60 : vector<8x128xf32>
    %cst_48 = arith.constant 0.000000e+00 : f32
    %62 = vector.broadcast %cst_48 : f32 to vector<8x128xf32>
    %63 = arith.subf %62, %61 : vector<8x128xf32>
    %64 = math.exp %63 : vector<8x128xf32>
    %cst_49 = arith.constant 1.000000e+00 : f32
    %65 = vector.broadcast %cst_49 : f32 to vector<8x128xf32>
    %66 = arith.addf %65, %64 : vector<8x128xf32>
    %67 = tpu.reciprocal %66 {approx = true} : vector<8x128xf32> -> vector<8x128xf32>
    %cst_50 = arith.constant 0.000000e+00 : f32
    %cst_51 = arith.constant 1.000000e+00 : f32
    %68 = vector.broadcast %cst_50 : f32 to vector<8x128xf32>
    %69 = arith.maximumf %68, %67 : vector<8x128xf32>
    %70 = vector.broadcast %cst_51 : f32 to vector<8x128xf32>
    %71 = arith.minimumf %70, %69 : vector<8x128xf32>
    %c0_52 = arith.constant 0 : index
    %c0_53 = arith.constant 0 : index
    %72 = vector.load %arg19[%c0_52, %c0_53] : memref<8x128xf32, #tpu.memory_space<vmem>>, vector<8x128xf32>
    tpu.vector_store %arg19[%c0_52, %c0_53], %71 {strides = array<i32>} : memref<8x128xf32, #tpu.memory_space<vmem>>, vector<8x128xf32>,
    return
  }
  func.func @transform_0(%arg0: i32) -> (i32, i32) {
    %c0_i32 = arith.constant 0 : i32
    %c0_i32_0 = arith.constant 0 : i32
    %c0_i32_1 = arith.constant 0 : i32
    return %c0_i32, %c0_i32_0 : i32, i32
  }
  func.func @transform_1(%arg0: i32) -> (i32, i32) {
    %c0_i32 = arith.constant 0 : i32
    %c0_i32_0 = arith.constant 0 : i32
    %c0_i32_1 = arith.constant 0 : i32
    return %c0_i32, %c0_i32_0 : i32, i32
  }
  func.func @transform_2(%arg0: i32) -> (i32, i32) {
    %c0_i32 = arith.constant 0 : i32
    %c0_i32_0 = arith.constant 0 : i32
    %c0_i32_1 = arith.constant 0 : i32
    return %c0_i32, %c0_i32_0 : i32, i32
  }
  func.func @transform_3(%arg0: i32) -> (i32, i32) {
    %c0_i32 = arith.constant 0 : i32
    %c0_i32_0 = arith.constant 0 : i32
    %c0_i32_1 = arith.constant 0 : i32
    return %c0_i32, %c0_i32_0 : i32, i32
  }
  func.func @transform_4(%arg0: i32) -> (i32, i32) {
    %c0_i32 = arith.constant 0 : i32
    %c0_i32_0 = arith.constant 0 : i32
    %c0_i32_1 = arith.constant 0 : i32
    return %c0_i32, %c0_i32_0 : i32, i32
  }
  func.func @transform_5(%arg0: i32) -> (i32, i32) {
    %c0_i32 = arith.constant 0 : i32
    %c0_i32_0 = arith.constant 0 : i32
    %c0_i32_1 = arith.constant 0 : i32
    return %c0_i32, %c0_i32_0 : i32, i32
  }
  func.func @transform_6(%arg0: i32) -> (i32, i32) {
    %c0_i32 = arith.constant 0 : i32
    %c0_i32_0 = arith.constant 0 : i32
    %c0_i32_1 = arith.constant 0 : i32
    return %c0_i32, %c0_i32_0 : i32, i32
  }
  func.func @transform_7(%arg0: i32) -> (i32, i32) {
    %c0_i32 = arith.constant 0 : i32
    %c0_i32_0 = arith.constant 0 : i32
    %c0_i32_1 = arith.constant 0 : i32
    return %c0_i32, %c0_i32_0 : i32, i32
  }
  func.func @transform_8(%arg0: i32) -> (i32, i32) {
    %c0_i32 = arith.constant 0 : i32
    %c0_i32_0 = arith.constant 0 : i32
    %c0_i32_1 = arith.constant 0 : i32
    return %c0_i32, %c0_i32_0 : i32, i32
  }
  func.func @transform_9(%arg0: i32) -> (i32, i32) {
    %c0_i32 = arith.constant 0 : i32
    %c0_i32_0 = arith.constant 0 : i32
    %c0_i32_1 = arith.constant 0 : i32
    return %c0_i32, %c0_i32_0 : i32, i32
  }
  func.func @transform_10(%arg0: i32) -> (i32, i32) {
    %c0_i32 = arith.constant 0 : i32
    %c0_i32_0 = arith.constant 0 : i32
    %c0_i32_1 = arith.constant 0 : i32
    return %c0_i32, %c0_i32_0 : i32, i32
  }
  func.func @transform_11(%arg0: i32) -> (i32, i32) {
    %c0_i32 = arith.constant 0 : i32
    %c0_i32_0 = arith.constant 0 : i32
    %c0_i32_1 = arith.constant 0 : i32
    return %c0_i32, %c0_i32_0 : i32, i32
  }
  func.func @transform_12(%arg0: i32) -> (i32, i32) {
    %c0_i32 = arith.constant 0 : i32
    %c0_i32_0 = arith.constant 0 : i32
    %c0_i32_1 = arith.constant 0 : i32
    return %c0_i32, %c0_i32_0 : i32, i32
  }
  func.func @transform_13(%arg0: i32) -> (i32, i32) {
    %c0_i32 = arith.constant 0 : i32
    %c0_i32_0 = arith.constant 0 : i32
    %c0_i32_1 = arith.constant 0 : i32
    return %c0_i32, %c0_i32_0 : i32, i32
  }
  func.func @transform_14(%arg0: i32) -> (i32, i32) {
    %c0_i32 = arith.constant 0 : i32
    %c0_i32_0 = arith.constant 0 : i32
    %c0_i32_1 = arith.constant 0 : i32
    return %c0_i32, %c0_i32_0 : i32, i32
  }
  func.func @transform_15(%arg0: i32) -> (i32, i32) {
    %c0_i32 = arith.constant 0 : i32
    %c0_i32_0 = arith.constant 0 : i32
    %c0_i32_1 = arith.constant 0 : i32
    return %c0_i32, %c0_i32_0 : i32, i32
  }
  func.func @transform_16(%arg0: i32) -> (i32, i32) {
    %c0_i32 = arith.constant 0 : i32
    %c0_i32_0 = arith.constant 0 : i32
    %c0_i32_1 = arith.constant 0 : i32
    return %c0_i32, %c0_i32_0 : i32, i32
  }
  func.func @transform_17(%arg0: i32) -> (i32, i32) {
    %c0_i32 = arith.constant 0 : i32
    %c0_i32_0 = arith.constant 0 : i32
    %c0_i32_1 = arith.constant 0 : i32
    return %c0_i32, %c0_i32_0 : i32, i32
  }
  func.func @transform_18(%arg0: i32) -> (i32, i32) {
    %c0_i32 = arith.constant 0 : i32
    %c0_i32_0 = arith.constant 0 : i32
    %c0_i32_1 = arith.constant 0 : i32
    return %c0_i32, %c0_i32_0 : i32, i32
  }
}

</mosaic_0001>

<bundles_post_ra>
// kernel: tpu_custom_call.1
= control target key start
LH: loop header
LB: loop body
LE: loop exit
PB: predicated region body
PF: predicated region fallthrough
CT: control target
= control target key end

     0   :  { %s2141_s0 = inlined_call_operand.hbm [shape: bf16[8,128], index: 0, kind: input, shape index: {}]   ;;  %s2142_s1 = inlined_call_operand.hbm [shape: bf16[128,128], index: 1, kind: input, shape index: {}]   ;;  %s2143_s2 = inlined_call_operand.vmem [shape: f32[1,128], index: 2, kind: input, shape index: {}]   ;;  %s2144_s3 = inlined_call_operand.hbm [shape: bf16[128,128], index: 3, kind: input, shape index: {}]   ;;  %s2145_s4 = inlined_call_operand.vmem [shape: f32[1,128], index: 4, kind: input, shape index: {}]   ;;  %s2146_s5 = inlined_call_operand.hbm [shape: bf16[128,128], index: 5, kind: input, shape index: {}]   ;;  %s2147_s6 = inlined_call_operand.vmem [shape: f32[1,128], index: 6, kind: input, shape index: {}]   ;;  %s2148_s7 = inlined_call_operand.hbm [shape: bf16[128,128], index: 7, kind: input, shape index: {}]   ;;  %s2149_s8 = inlined_call_operand.vmem [shape: f32[1,128], index: 8, kind: input, shape index: {}]   ;;  %s2150_s9 = inlined_call_operand.hbm [shape: bf16[128,128], index: 9, kind: input, shape index: {}]   ;;  %s2151_s10 = inlined_call_operand.vmem [shape: f32[1,128], index: 10, kind: input, shape index: {}]   ;;  %s2152_s11 = inlined_call_operand.hbm [shape: bf16[128,128], index: 11, kind: input, shape index: {}]   ;;  %s2153_s12 = inlined_call_operand.vmem [shape: f32[1,128], index: 12, kind: input, shape index: {}]   ;;  %s2154_s13 = inlined_call_operand.hbm [shape: bf16[128,128], index: 13, kind: input, shape index: {}]   ;;  %s2155_s14 = inlined_call_operand.vmem [shape: f32[1,128], index: 14, kind: input, shape index: {}]   ;;  %s2156_s15 = inlined_call_operand.hbm [shape: bf16[128,128], index: 15, kind: input, shape index: {}]   ;;  %s2157_s16 = inlined_call_operand.vmem [shape: f32[1,128], index: 16, kind: input, shape index: {}]   ;;  %s2158_s17 = inlined_call_operand.hbm [shape: f32[8,128], index: 17, kind: output, shape index: {0}]   ;;  %s2159_s18 = inlined_call_operand.hbm [shape: f32[8,128], index: 18, kind: output, shape index: {1}]  }
   0x1   :  { %2163 = sst [smem:[#allocation27_spill]] %s2141_s0 }
   0x2   :  { %2164 = sst [smem:[#allocation28_spill]] %s2142_s1 }
   0x3   :  { %2165 = sst [smem:[#allocation29_spill]] %s2143_s2 }
   0x4   :  { %2166 = sst [smem:[#allocation30_spill]] %s2157_s16 }
   0x5   :  { %2167 = sst [smem:[#allocation31_spill]] %s2159_s18 }
   0x6   :  { %24 = vsyncpa [#allocation3], 0 }
   0x7   :  { %25 = vsyncpa [#allocation6], 0 }
   0x8   :  { %26 = vsyncpa [#allocation9], 0 }
   0x9   :  { %27 = vsyncpa [#allocation12], 0 }
   0xa   :  { %28 = vsyncpa [#allocation15], 0 }
   0xb   :  { %29 = vsyncpa [#allocation4], 0 }
   0xc   :  { %30 = vsyncpa [#allocation19], 0  ;;  %s1771_s27 = smov [#allocation5]   ;;  %s2168_s0 = sld [smem:[#allocation28_spill]] }
   0xd   :  { %s46_s28 = sshll.u32 %s1771_s27, 4  ;;  %s47_s28 = int_to_ptr.vmem [resolvable:$true] %s46_s28 }
  0x12   :  { %s1515_s19 = scalar_lea.hbm %s2168_s0, 1024 }
  0x13   :  { %p1516_p0 = scmp.ne.s32.totalorder %s2168_s0, %s1515_s19  ;;  %p1519_p1 = scmp.lt.u32.totalorder %s1515_s19, %s2168_s0 }
  0x15   :  { %p1521_p2 = pnand %p1519_p1, %p1516_p0 }
  0x17   :  { %1524 = shalt.err (!%p1521_p2)
}
  0x18   :  { %s1525_s2 = scalar_lea.vmem %s47_s28, 1024  ;;  %p1530_p4 = scmp.lt.s32.totalorder %s47_s28, %s47_s28 }
  0x19   :  { %p1526_p3 = scmp.ne.s32.totalorder %s47_s28, %s1525_s2  ;;  %p1531_p5 = scmp.lt.s32.totalorder %s1525_s2, %s1525_s2 }
  0x1b   :  { %p1532_p6 = por %p1531_p5, %p1530_p4 }
  0x1d   :  { %p1533_p7 = pnand %p1532_p6, %p1526_p3 }
  0x1f   :  { %1536 = shalt.err (!%p1533_p7)
}
  0x20   :  { %s1772_s23 = smov 64   ;;  %s1773_s24 = smov 4  }
  0x21   :  { %52 = dma.hbm_to_vmem [thread:$0]  %s2168_s0, 1024, %s47_s28, [#allocation6], %s1772_s23, %s1772_s23, %s1773_s24  }
  0x22   :  { %s1774_s27 = smov [#allocation8]   ;;  %s1775_s30 = smov [#allocation11]  }
  0x23   :  { %s74_s29 = sshll.u32 %s1774_s27, 4  ;;  %s102_s19 = sshll.u32 %s1775_s30, 4  ;;  %s75_s29 = int_to_ptr.vmem [resolvable:$true] %s74_s29  ;;  %s103_s19 = int_to_ptr.vmem [resolvable:$true] %s102_s19 }
  0x24   :  { %s1537_s21 = scalar_lea.hbm %s2146_s5, 1024 }
  0x25   :  { %p1538_p8 = scmp.ne.s32.totalorder %s2146_s5, %s1537_s21  ;;  %p1541_p9 = scmp.lt.u32.totalorder %s1537_s21, %s2146_s5 }
  0x27   :  { %p1543_p10 = pnand %p1541_p9, %p1538_p8 }
  0x29   :  { %1546 = shalt.err (!%p1543_p10)
}
  0x2a   :  { %s1547_s28 = scalar_lea.vmem %s75_s29, 1024  ;;  %p1552_p12 = scmp.lt.s32.totalorder %s75_s29, %s75_s29 }
  0x2b   :  { %p1548_p11 = scmp.ne.s32.totalorder %s75_s29, %s1547_s28  ;;  %p1553_p13 = scmp.lt.s32.totalorder %s1547_s28, %s1547_s28 }
  0x2d   :  { %p1554_p0 = por %p1553_p13, %p1552_p12 }
  0x2f   :  { %p1555_p1 = pnand %p1554_p0, %p1548_p11 }
  0x31   :  { %1558 = shalt.err (!%p1555_p1)
}
  0x32   :  { %80 = dma.hbm_to_vmem [thread:$0]  %s2146_s5, 1024, %s75_s29, [#allocation9], %s1772_s23, %s1772_s23, %s1773_s24  }
  0x33   :  { %s1559_s18 = scalar_lea.hbm %s2150_s9, 1024 }
  0x34   :  { %p1560_p2 = scmp.ne.s32.totalorder %s2150_s9, %s1559_s18  ;;  %p1563_p3 = scmp.lt.u32.totalorder %s1559_s18, %s2150_s9 }
  0x36   :  { %p1565_p4 = pnand %p1563_p3, %p1560_p2 }
  0x38   :  { %1568 = shalt.err (!%p1565_p4)
}
  0x39   :  { %s1569_s21 = scalar_lea.vmem %s103_s19, 1024  ;;  %p1574_p6 = scmp.lt.s32.totalorder %s103_s19, %s103_s19 }
  0x3a   :  { %p1570_p5 = scmp.ne.s32.totalorder %s103_s19, %s1569_s21  ;;  %p1575_p7 = scmp.lt.s32.totalorder %s1569_s21, %s1569_s21 }
  0x3c   :  { %p1576_p8 = por %p1575_p7, %p1574_p6 }
  0x3e   :  { %p1577_p9 = pnand %p1576_p8, %p1570_p5 }
  0x40   :  { %1580 = shalt.err (!%p1577_p9)
}
  0x41   :  { %108 = dma.hbm_to_vmem [thread:$0]  %s2150_s9, 1024, %s103_s19, [#allocation12], %s1772_s23, %s1772_s23, %s1773_s24  }
  0x42   :  { %s1776_s22 = smov [#allocation14]   ;;  %s1777_s28 = smov [#allocation2]  }
  0x43   :  { %s130_s2 = sshll.u32 %s1776_s22, 4  ;;  %s37_s0 = sshll.u32 %s1777_s28, 4  ;;  %s131_s2 = int_to_ptr.vmem [resolvable:$true] %s130_s2  ;;  %s38_s0 = int_to_ptr.vmem [resolvable:$true] %s37_s0 }
  0x44   :  { %s1581_s16 = scalar_lea.hbm %s2154_s13, 1024 }
  0x45   :  { %p1582_p10 = scmp.ne.s32.totalorder %s2154_s13, %s1581_s16  ;;  %p1585_p11 = scmp.lt.u32.totalorder %s1581_s16, %s2154_s13 }
  0x47   :  { %p1587_p12 = pnand %p1585_p11, %p1582_p10 }
  0x49   :  { %1590 = shalt.err (!%p1587_p12)
}
  0x4a   :  { %s1591_s9 = scalar_lea.vmem %s131_s2, 1024  ;;  %p1596_p0 = scmp.lt.s32.totalorder %s131_s2, %s131_s2 }
  0x4b   :  { %p1592_p13 = scmp.ne.s32.totalorder %s131_s2, %s1591_s9  ;;  %p1597_p1 = scmp.lt.s32.totalorder %s1591_s9, %s1591_s9 }
  0x4d   :  { %p1598_p2 = por %p1597_p1, %p1596_p0 }
  0x4f   :  { %p1599_p3 = pnand %p1598_p2, %p1592_p13 }
  0x51   :  { %1602 = shalt.err (!%p1599_p3)
}
  0x52   :  { %136 = dma.hbm_to_vmem [thread:$0]  %s2154_s13, 1024, %s131_s2, [#allocation15], %s1772_s23, %s1772_s23, %s1773_s24  }
  0x53   :  { %s2169_s29 = sld [smem:[#allocation27_spill]] }
  0x59   :  { %s1603_s22 = scalar_lea.hbm %s2169_s29, 64 }
  0x5a   :  { %p1604_p4 = scmp.ne.s32.totalorder %s2169_s29, %s1603_s22  ;;  %p1607_p5 = scmp.lt.u32.totalorder %s1603_s22, %s2169_s29 }
  0x5c   :  { %p1609_p6 = pnand %p1607_p5, %p1604_p4 }
  0x5e   :  { %1612 = shalt.err (!%p1609_p6)
}
  0x5f   :  { %s1613_s18 = scalar_lea.vmem %s38_s0, 64  ;;  %p1618_p8 = scmp.lt.s32.totalorder %s38_s0, %s38_s0 }
  0x60   :  { %p1614_p7 = scmp.ne.s32.totalorder %s38_s0, %s1613_s18  ;;  %p1619_p9 = scmp.lt.s32.totalorder %s1613_s18, %s1613_s18 }
  0x62   :  { %p1620_p10 = por %p1619_p9, %p1618_p8 }
  0x64   :  { %p1621_p11 = pnand %p1620_p10, %p1614_p7 }
  0x66   :  { %1624 = shalt.err (!%p1621_p11)
}
  0x67   :  { %40 = dma.hbm_to_vmem [thread:$0]  %s2169_s29, 64, %s38_s0, [#allocation3]  }
  0x68   :  { %s1778_s27 = smov [#allocation7]   ;;  %s1779_s1 = smov [#allocation10]  }
  0x69   :  { %s60_s30 = sshll.u32 %s1778_s27, 4  ;;  %s88_s9 = sshll.u32 %s1779_s1, 4  ;;  %s61_s30 = int_to_ptr.vmem [resolvable:$true] %s60_s30  ;;  %s89_s9 = int_to_ptr.vmem [resolvable:$true] %s88_s9 }
  0x6a   :  { %s1625_s21 = scalar_lea.hbm %s2144_s3, 1024 }
  0x6b   :  { %p1626_p12 = scmp.ne.s32.totalorder %s2144_s3, %s1625_s21  ;;  %p1629_p13 = scmp.lt.u32.totalorder %s1625_s21, %s2144_s3 }
  0x6d   :  { %p1631_p0 = pnand %p1629_p13, %p1626_p12 }
  0x6f   :  { %1634 = shalt.err (!%p1631_p0)
}
  0x70   :  { %s1635_s0 = scalar_lea.vmem %s61_s30, 1024  ;;  %p1640_p2 = scmp.lt.s32.totalorder %s61_s30, %s61_s30 }
  0x71   :  { %p1636_p1 = scmp.ne.s32.totalorder %s61_s30, %s1635_s0  ;;  %p1641_p3 = scmp.lt.s32.totalorder %s1635_s0, %s1635_s0 }
  0x73   :  { %p1642_p4 = por %p1641_p3, %p1640_p2 }
  0x75   :  { %p1643_p5 = pnand %p1642_p4, %p1636_p1 }
  0x77   :  { %1646 = shalt.err (!%p1643_p5)
}
  0x78   :  { %66 = dma.hbm_to_vmem [thread:$0]  %s2144_s3, 1024, %s61_s30, [#allocation6], %s1772_s23, %s1772_s23, %s1773_s24  }
  0x79   :  { %s1647_s13 = scalar_lea.hbm %s2148_s7, 1024 }
  0x7a   :  { %p1648_p6 = scmp.ne.s32.totalorder %s2148_s7, %s1647_s13  ;;  %p1651_p7 = scmp.lt.u32.totalorder %s1647_s13, %s2148_s7 }
  0x7c   :  { %p1653_p8 = pnand %p1651_p7, %p1648_p6 }
  0x7e   :  { %1656 = shalt.err (!%p1653_p8)
}
  0x7f   :  { %s1657_s20 = scalar_lea.vmem %s89_s9, 1024  ;;  %p1662_p10 = scmp.lt.s32.totalorder %s89_s9, %s89_s9 }
  0x80   :  { %p1658_p9 = scmp.ne.s32.totalorder %s89_s9, %s1657_s20  ;;  %p1663_p11 = scmp.lt.s32.totalorder %s1657_s20, %s1657_s20 }
  0x82   :  { %p1664_p12 = por %p1663_p11, %p1662_p10 }
  0x84   :  { %p1665_p13 = pnand %p1664_p12, %p1658_p9 }
  0x86   :  { %1668 = shalt.err (!%p1665_p13)
}
  0x87   :  { %94 = dma.hbm_to_vmem [thread:$0]  %s2148_s7, 1024, %s89_s9, [#allocation9], %s1772_s23, %s1772_s23, %s1773_s24  }
  0x88   :  { %s1780_s21 = smov [#allocation13]   ;;  %s1781_s22 = smov [#allocation16]  }
  0x89   :  { %s116_s5 = sshll.u32 %s1780_s21, 4  ;;  %s144_s28 = sshll.u32 %s1781_s22, 4  ;;  %s117_s5 = int_to_ptr.vmem [resolvable:$true] %s116_s5  ;;  %s145_s28 = int_to_ptr.vmem [resolvable:$true] %s144_s28 }
  0x8a   :  { %s1669_s29 = scalar_lea.hbm %s2152_s11, 1024 }
  0x8b   :  { %p1670_p0 = scmp.ne.s32.totalorder %s2152_s11, %s1669_s29  ;;  %p1673_p1 = scmp.lt.u32.totalorder %s1669_s29, %s2152_s11 }
  0x8d   :  { %p1675_p2 = pnand %p1673_p1, %p1670_p0 }
  0x8f   :  { %1678 = shalt.err (!%p1675_p2)
}
  0x90   :  { %s1679_s7 = scalar_lea.vmem %s117_s5, 1024  ;;  %p1684_p4 = scmp.lt.s32.totalorder %s117_s5, %s117_s5 }
  0x91   :  { %p1680_p3 = scmp.ne.s32.totalorder %s117_s5, %s1679_s7  ;;  %p1685_p5 = scmp.lt.s32.totalorder %s1679_s7, %s1679_s7 }
  0x93   :  { %p1686_p6 = por %p1685_p5, %p1684_p4 }
  0x95   :  { %p1687_p7 = pnand %p1686_p6, %p1680_p3 }
  0x97   :  { %1690 = shalt.err (!%p1687_p7)
}
  0x98   :  { %122 = dma.hbm_to_vmem [thread:$0]  %s2152_s11, 1024, %s117_s5, [#allocation12], %s1772_s23, %s1772_s23, %s1773_s24  }
  0x99   :  { %s1691_s19 = scalar_lea.hbm %s2156_s15, 1024 }
  0x9a   :  { %p1692_p8 = scmp.ne.s32.totalorder %s2156_s15, %s1691_s19  ;;  %p1695_p9 = scmp.lt.u32.totalorder %s1691_s19, %s2156_s15 }
  0x9c   :  { %p1697_p10 = pnand %p1695_p9, %p1692_p8 }
  0x9e   :  { %1700 = shalt.err (!%p1697_p10)
}
  0x9f   :  { %s1701_s22 = scalar_lea.vmem %s145_s28, 1024  ;;  %p1706_p12 = scmp.lt.s32.totalorder %s145_s28, %s145_s28 }
  0xa0   :  { %p1702_p11 = scmp.ne.s32.totalorder %s145_s28, %s1701_s22  ;;  %p1707_p13 = scmp.lt.s32.totalorder %s1701_s22, %s1701_s22 }
  0xa2   :  { %p1708_p0 = por %p1707_p13, %p1706_p12 }
  0xa4   :  { %p1709_p1 = pnand %p1708_p0, %p1702_p11 }
  0xa6   :  { %1712 = shalt.err (!%p1709_p1)
}
  0xa7   :  { %150 = dma.hbm_to_vmem [thread:$0]  %s2156_s15, 1024, %s145_s28, [#allocation15], %s1772_s23, %s1772_s23, %s1773_s24  }
  0xa8   :  { %1757 = dma.done.wait [#allocation3], 64  }
  0xa9   :  { %1758 = vsyncadd [#allocation3], 4294967232 }
  0xaa   :  { %1759 = dma.done.wait [#allocation6], 2048  }
  0xab   :  { %1760 = vsyncadd [#allocation6], 4294965248 }
  0xac   :  { %1761 = dma.done.wait [#allocation9], 2048  }
  0xad   :  { %1762 = vsyncadd [#allocation9], 4294965248 }
  0xae   :  { %1763 = dma.done.wait [#allocation12], 2048  }
  0xaf   :  { %1764 = vsyncadd [#allocation12], 4294965248 }
  0xb0   :  { %1765 = dma.done.wait [#allocation15], 2048  }
  0xb1   :  { %1766 = vsyncadd [#allocation15], 4294965248  ;;  %v1782_v0 = vmov 0.0   ;;  %vm1783_vm0 = vmmov 0   ;;  %v1445_v1 = vld [vmem:[#allocation5] sm:$0xff]   ;;  %v1446_v2 = vld [vmem:[#allocation5 + $0x8] sm:$0xff]  }
  0xb2   :  { %1270 = vmatprep.subr.bf16.mxu0 %v1782_v0  ;;  %1286 = vmatprep.mubr.msk.bf16.mxu0 %vm1783_vm0, %v1782_v0  ;;  %v1447_v3 = vld [vmem:[#allocation5 + $0x10] sm:$0xff]   ;;  %v1453_v4 = vld [vmem:[#allocation7] sm:$0xff]   ;;  %v1448_v5 = vld [vmem:[#allocation5 + $0x18] sm:$0xff]   ;;  %s2170_s24 = sld [smem:[#allocation29_spill]] }
  0xb3   :  { %1290 = vmatprep.subr.bf16.mxu1 %v1782_v0  ;;  %1306 = vmatprep.mubr.msk.bf16.mxu1 %vm1783_vm0, %v1782_v0  ;;  %v1454_v6 = vld [vmem:[#allocation7 + $0x8] sm:$0xff]   ;;  %v1449_v7 = vld [vmem:[#allocation5 + $0x20] sm:$0xff]   ;;  %v1455_v8 = vld [vmem:[#allocation7 + $0x10] sm:$0xff]  }
  0xb4   :  { %1271 = vmatpush3.bf16.msra.mxu0 %v1445_v1  ;;  %1291 = vmatpush3.bf16.msra.mxu1 %v1453_v4  ;;  %v1450_v9 = vld [vmem:[#allocation5 + $0x28] sm:$0xff]   ;;  %v1456_v10 = vld [vmem:[#allocation7 + $0x18] sm:$0xff]   ;;  %v1451_v11 = vld [vmem:[#allocation5 + $0x30] sm:$0xff]  }
  0xb5   :  { %1272 = vmatprep.subr.bf16.mxu0 %v1782_v0  ;;  %1292 = vmatprep.subr.bf16.mxu1 %v1782_v0  ;;  %v1457_v12 = vld [vmem:[#allocation7 + $0x20] sm:$0xff]   ;;  %v1452_v13 = vld [vmem:[#allocation5 + $0x38] sm:$0xff]   ;;  %v1458_v14 = vld [vmem:[#allocation7 + $0x28] sm:$0xff]  }
  0xb6   :  { %v181_v15 = vld [vmem:[#allocation2] sm:$0xf]  ;;  %v1459_v16 = vld [vmem:[#allocation7 + $0x30] sm:$0xff]   ;;  %v1461_v18 = vld [vmem:[#allocation8] sm:$0xff]  }
  0xb7   :  { %v1460_v17 = vld [vmem:[#allocation7 + $0x38] sm:$0xff]   ;;  %v1462_v19 = vld [vmem:[#allocation8 + $0x8] sm:$0xff]   ;;  %v1463_v20 = vld [vmem:[#allocation8 + $0x10] sm:$0xff]  }
  0xb8   :  { %1273 = vmatpush3.bf16.msra.mxu0 %v1446_v2  ;;  %1293 = vmatpush3.bf16.msra.mxu1 %v1454_v6  ;;  %v1464_v21 = vld [vmem:[#allocation8 + $0x18] sm:$0xff]   ;;  %v1465_v22 = vld [vmem:[#allocation8 + $0x20] sm:$0xff]   ;;  %v1466_v23 = vld [vmem:[#allocation8 + $0x28] sm:$0xff]  }
  0xb9   :  { %1274 = vmatprep.subr.bf16.mxu0 %v1782_v0  ;;  %1294 = vmatprep.subr.bf16.mxu1 %v1782_v0  ;;  %v1126_v24 = vld [vmem:[%s2170_s24] ss:$0 sm:$0xff]  ;;  %v1467_v32 = vld [vmem:[#allocation8 + $0x30] sm:$0xff]   ;;  %v1469_v34 = vld [vmem:[#allocation10] sm:$0xff]  }
  0xba   :  { %v1468_v33 = vld [vmem:[#allocation8 + $0x38] sm:$0xff]   ;;  %v1470_v35 = vld [vmem:[#allocation10 + $0x8] sm:$0xff]   ;;  %v1471_v36 = vld [vmem:[#allocation10 + $0x10] sm:$0xff]  }
  0xbb   :  { %v1472_v37 = vld [vmem:[#allocation10 + $0x18] sm:$0xff]   ;;  %v1473_v38 = vld [vmem:[#allocation10 + $0x20] sm:$0xff]   ;;  %v1474_v39 = vld [vmem:[#allocation10 + $0x28] sm:$0xff]  }
  0xbc   :  { %1275 = vmatpush3.bf16.msra.mxu0 %v1447_v3  ;;  %1295 = vmatpush3.bf16.msra.mxu1 %v1455_v8  ;;  %v1135_v40 = vld [vmem:[%s2145_s4] ss:$0 sm:$0xff]  ;;  %v1475_v48 = vld [vmem:[#allocation10 + $0x30] sm:$0xff]   ;;  %v1477_v50 = vld [vmem:[#allocation11] sm:$0xff]  }
  0xbd   :  { %1276 = vmatprep.subr.bf16.mxu0 %v1782_v0  ;;  %1296 = vmatprep.subr.bf16.mxu1 %v1782_v0  ;;  %v1476_v49 = vld [vmem:[#allocation10 + $0x38] sm:$0xff]   ;;  %v1478_v51 = vld [vmem:[#allocation11 + $0x8] sm:$0xff]   ;;  %v1479_v52 = vld [vmem:[#allocation11 + $0x10] sm:$0xff]  }
  0xbe   :  { %v1480_v53 = vld [vmem:[#allocation11 + $0x18] sm:$0xff]   ;;  %v1481_v62 = vld [vmem:[#allocation11 + $0x20] sm:$0xff]   ;;  %v1482_v63 = vld [vmem:[#allocation11 + $0x28] sm:$0xff]  }
  0xbf   :  { %v1144_v54 = vld [vmem:[%s2147_s6] ss:$0 sm:$0xff]  ;;  %v1483_v1 = vld [vmem:[#allocation11 + $0x30] sm:$0xff]   ;;  %v1485_v3 = vld [vmem:[#allocation13] sm:$0xff]  }
  0xc0   :  { %1277 = vmatpush3.bf16.msra.mxu0 %v1448_v5  ;;  %1297 = vmatpush3.bf16.msra.mxu1 %v1456_v10  ;;  %v1484_v2 = vld [vmem:[#allocation11 + $0x38] sm:$0xff]   ;;  %v1486_v4 = vld [vmem:[#allocation13 + $0x8] sm:$0xff]   ;;  %v1487_v5 = vld [vmem:[#allocation13 + $0x10] sm:$0xff]  }
  0xc1   :  { %1278 = vmatprep.subr.bf16.mxu0 %v1782_v0  ;;  %1298 = vmatprep.subr.bf16.mxu1 %v1782_v0  ;;  %v1488_v6 = vld [vmem:[#allocation13 + $0x18] sm:$0xff]   ;;  %v1490_v8 = vld [vmem:[#allocation13 + $0x28] sm:$0xff]  }
  0xc4   :  { %1279 = vmatpush3.bf16.msra.mxu0 %v1449_v7  ;;  %1299 = vmatpush3.bf16.msra.mxu1 %v1457_v12  ;;  %v1489_v7 = vld [vmem:[#allocation13 + $0x20] sm:$0xff]  }
  0xc5   :  { %1280 = vmatprep.subr.bf16.mxu0 %v1782_v0  ;;  %1300 = vmatprep.subr.bf16.mxu1 %v1782_v0 }
  0xc8   :  { %1281 = vmatpush3.bf16.msra.mxu0 %v1450_v9  ;;  %1301 = vmatpush3.bf16.msra.mxu1 %v1458_v14  ;;  %v1153_v9 = vld [vmem:[%s2149_s8] ss:$0 sm:$0xff] }
  0xc9   :  { %1282 = vmatprep.subr.bf16.mxu0 %v1782_v0  ;;  %1302 = vmatprep.subr.bf16.mxu1 %v1782_v0 }
  0xcc   :  { %1283 = vmatpush3.bf16.msra.mxu0 %v1451_v11  ;;  %1303 = vmatpush3.bf16.msra.mxu1 %v1459_v16 }
  0xcd   :  { %1284 = vmatprep.subr.bf16.mxu0 %v1782_v0  ;;  %1304 = vmatprep.subr.bf16.mxu1 %v1782_v0 }
  0xd0   :  { %1285 = vmatpush3.bf16.msra.mxu0 %v1452_v13  ;;  %1305 = vmatpush3.bf16.msra.mxu1 %v1460_v17  ;;  %v1491_v17 = vld [vmem:[#allocation13 + $0x30] sm:$0xff]  }
  0xd1   :  { %1310 = vmatprep.subr.bf16.mxu0 %v1782_v0  ;;  %1330 = vmatprep.subr.bf16.mxu1 %v1782_v0 }
  0xd3   :  { %1287 = vmatmul.mubr.bf16.vlgmr.msra.gmra.mrb[0].mxu0 %v181_v15 }
  0xd4   :  { %1326 = vmatprep.mubr.msk.bf16.mxu0 %vm1783_vm0, %v1782_v0  ;;  %1311 = vmatpush3.bf16.msra.mxu0 %v1461_v18  ;;  %v1492_v18 = vld [vmem:[#allocation13 + $0x38] sm:$0xff]  }
  0xd5   :  { %1312 = vmatprep.subr.bf16.mxu0 %v1782_v0 }
  0xd8   :  { %1313 = vmatpush3.bf16.msra.mxu0 %v1462_v19  ;;  %v1493_v19 = vld [vmem:[#allocation14] sm:$0xff]  }
  0xd9   :  { %1314 = vmatprep.subr.bf16.mxu0 %v1782_v0 }
  0xdc   :  { %1315 = vmatpush3.bf16.msra.mxu0 %v1463_v20  ;;  %v1494_v20 = vld [vmem:[#allocation14 + $0x8] sm:$0xff]  }
  0xdd   :  { %1316 = vmatprep.subr.bf16.mxu0 %v1782_v0 }
  0xe0   :  { %1317 = vmatpush3.bf16.msra.mxu0 %v1464_v21  ;;  %v1495_v21 = vld [vmem:[#allocation14 + $0x10] sm:$0xff]  }
  0xe1   :  { %1318 = vmatprep.subr.bf16.mxu0 %v1782_v0 }
  0xe4   :  { %1319 = vmatpush3.bf16.msra.mxu0 %v1465_v22  ;;  %v1496_v22 = vld [vmem:[#allocation14 + $0x18] sm:$0xff]  }
  0xe5   :  { %1320 = vmatprep.subr.bf16.mxu0 %v1782_v0 }
  0xe8   :  { %1321 = vmatpush3.bf16.msra.mxu0 %v1466_v23  ;;  %v1497_v23 = vld [vmem:[#allocation14 + $0x20] sm:$0xff]  }
  0xe9   :  { %1322 = vmatprep.subr.bf16.mxu0 %v1782_v0 }
  0xec   :  { %1323 = vmatpush3.bf16.msra.mxu0 %v1467_v32 }
  0xed   :  { %1324 = vmatprep.subr.bf16.mxu0 %v1782_v0 }
  0xf0   :  { %1325 = vmatpush3.bf16.msra.mxu0 %v1468_v33  ;;  %v1499_v33 = vld [vmem:[#allocation14 + $0x30] sm:$0xff]  }
  0xf1   :  { %1350 = vmatprep.subr.bf16.mxu0 %v1782_v0 }
 0x1a6   :  { %v287_v25 = vpop.f32.mrb[0].mxu0 }
 0x1a7   :  { %v288_v26 = vadd.f32 %v1126_v24, %v287_v25  ;;  %v1288_v27 = vpop.f32.mrb[1].mxu0  ;;  %v1498_v24 = vld [vmem:[#allocation14 + $0x28] sm:$0xff]   ;;  %v1162_v25 = vld [vmem:[%s2151_s10] ss:$0 sm:$0xff] }
 0x1a8   :  { %v290_v28 = vpop.f32.mrb[2].mxu0 }
 0x1a9   :  { %v293_v29 = vmax.f32 %v288_v26, 0.0  ;;  %v1289_v30 = vpop.f32.mrb[3].mxu0 }
 0x1ab   :  { %v294_v31 = vpack.c.bf16 %v293_v29, %v293_v29 }
 0x1ad   :  { %1307 = vmatmul.mubr.bf16.vlgmr.msra.gmra.mrb[0].mxu1 %v294_v31 }
 0x1ae   :  { %1346 = vmatprep.mubr.msk.bf16.mxu1 %vm1783_vm0, %v1782_v0  ;;  %1331 = vmatpush3.bf16.msra.mxu1 %v1469_v34  ;;  %v1500_v34 = vld [vmem:[#allocation14 + $0x38] sm:$0xff]  }
 0x1af   :  { %1332 = vmatprep.subr.bf16.mxu1 %v1782_v0 }
 0x1b2   :  { %1333 = vmatpush3.bf16.msra.mxu1 %v1470_v35  ;;  %v1501_v35 = vld [vmem:[#allocation16] sm:$0xff]  }
 0x1b3   :  { %1334 = vmatprep.subr.bf16.mxu1 %v1782_v0 }
 0x1b6   :  { %1335 = vmatpush3.bf16.msra.mxu1 %v1471_v36  ;;  %v1502_v36 = vld [vmem:[#allocation16 + $0x8] sm:$0xff]  }
 0x1b7   :  { %1336 = vmatprep.subr.bf16.mxu1 %v1782_v0 }
 0x1ba   :  { %1337 = vmatpush3.bf16.msra.mxu1 %v1472_v37  ;;  %v1503_v37 = vld [vmem:[#allocation16 + $0x10] sm:$0xff]  }
 0x1bb   :  { %1338 = vmatprep.subr.bf16.mxu1 %v1782_v0 }
 0x1be   :  { %1339 = vmatpush3.bf16.msra.mxu1 %v1473_v38  ;;  %v1504_v38 = vld [vmem:[#allocation16 + $0x18] sm:$0xff]  }
 0x1bf   :  { %1340 = vmatprep.subr.bf16.mxu1 %v1782_v0 }
 0x1c2   :  { %1341 = vmatpush3.bf16.msra.mxu1 %v1474_v39  ;;  %v1505_v39 = vld [vmem:[#allocation16 + $0x20] sm:$0xff]  }
 0x1c3   :  { %1342 = vmatprep.subr.bf16.mxu1 %v1782_v0 }
 0x1c6   :  { %1343 = vmatpush3.bf16.msra.mxu1 %v1475_v48 }
 0x1c7   :  { %1344 = vmatprep.subr.bf16.mxu1 %v1782_v0 }
 0x1ca   :  { %1345 = vmatpush3.bf16.msra.mxu1 %v1476_v49  ;;  %v1507_v49 = vld [vmem:[#allocation16 + $0x30] sm:$0xff]  }
 0x1cb   :  { %1370 = vmatprep.subr.bf16.mxu1 %v1782_v0 }
 0x280   :  { %v400_v41 = vpop.f32.mrb[0].mxu1 }
 0x281   :  { %v401_v42 = vadd.f32 %v1135_v40, %v400_v41  ;;  %v1308_v43 = vpop.f32.mrb[1].mxu1  ;;  %v1506_v40 = vld [vmem:[#allocation16 + $0x28] sm:$0xff]   ;;  %v1171_v41 = vld [vmem:[%s2153_s12] ss:$0 sm:$0xff]  ;;  %s1784_s12 = smov [#allocation17]  }
 0x282   :  { %v403_v44 = vpop.f32.mrb[2].mxu1  ;;  %s1099_s7 = sshll.u32 %s1784_s12, 4  ;;  %s1100_s7 = int_to_ptr.vmem [resolvable:$true] %s1099_s7 }
 0x283   :  { %v406_v45 = vmax.f32 %v401_v42, 0.0  ;;  %v1309_v46 = vpop.f32.mrb[3].mxu1  ;;  %s1713_s9 = scalar_lea.vmem %s1100_s7, 128  ;;  %p1718_p3 = scmp.lt.s32.totalorder %s1100_s7, %s1100_s7 }
 0x284   :  { %p1714_p2 = scmp.ne.s32.totalorder %s1100_s7, %s1713_s9  ;;  %p1719_p4 = scmp.lt.s32.totalorder %s1713_s9, %s1713_s9 }
 0x285   :  { %v407_v47 = vpack.c.bf16 %v406_v45, %v406_v45 }
 0x286   :  { %p1720_p5 = por %p1719_p4, %p1718_p3 }
 0x287   :  { %1327 = vmatmul.mubr.bf16.vlgmr.msra.gmra.mrb[4].mxu0 %v407_v47 }
 0x288   :  { %1366 = vmatprep.mubr.msk.bf16.mxu0 %vm1783_vm0, %v1782_v0  ;;  %1351 = vmatpush3.bf16.msra.mxu0 %v1477_v50  ;;  %v1508_v50 = vld [vmem:[#allocation16 + $0x38] sm:$0xff]   ;;  %p1721_p6 = pnand %p1720_p5, %p1714_p2 }
 0x289   :  { %1352 = vmatprep.subr.bf16.mxu0 %v1782_v0 }
 0x28c   :  { %1353 = vmatpush3.bf16.msra.mxu0 %v1478_v51  ;;  %v1180_v51 = vld [vmem:[%s2155_s14] ss:$0 sm:$0xff] }
 0x28d   :  { %1354 = vmatprep.subr.bf16.mxu0 %v1782_v0 }
 0x290   :  { %1355 = vmatpush3.bf16.msra.mxu0 %v1479_v52 }
 0x291   :  { %1356 = vmatprep.subr.bf16.mxu0 %v1782_v0 }
 0x294   :  { %1357 = vmatpush3.bf16.msra.mxu0 %v1480_v53 }
 0x295   :  { %1358 = vmatprep.subr.bf16.mxu0 %v1782_v0 }
 0x298   :  { %1359 = vmatpush3.bf16.msra.mxu0 %v1481_v62 }
 0x299   :  { %1360 = vmatprep.subr.bf16.mxu0 %v1782_v0 }
 0x29c   :  { %1361 = vmatpush3.bf16.msra.mxu0 %v1482_v63 }
 0x29d   :  { %1362 = vmatprep.subr.bf16.mxu0 %v1782_v0 }
 0x2a0   :  { %1363 = vmatpush3.bf16.msra.mxu0 %v1483_v1 }
 0x2a1   :  { %1364 = vmatprep.subr.bf16.mxu0 %v1782_v0 }
 0x2a4   :  { %1365 = vmatpush3.bf16.msra.mxu0 %v1484_v2 }
 0x2a5   :  { %1390 = vmatprep.subr.bf16.mxu0 %v1782_v0 }
 0x35a   :  { %v513_v55 = vpop.f32.mrb[4].mxu0 }
 0x35b   :  { %v514_v56 = vadd.f32 %v1144_v54, %v513_v55  ;;  %v1328_v57 = vpop.f32.mrb[5].mxu0 }
 0x35c   :  { %v516_v58 = vpop.f32.mrb[6].mxu0 }
 0x35d   :  { %v519_v59 = vmax.f32 %v514_v56, 0.0  ;;  %v1329_v60 = vpop.f32.mrb[7].mxu0 }
 0x35f   :  { %v520_v61 = vpack.c.bf16 %v519_v59, %v519_v59 }
 0x361   :  { %1347 = vmatmul.mubr.bf16.vlgmr.msra.gmra.mrb[4].mxu1 %v520_v61 }
 0x362   :  { %1386 = vmatprep.mubr.msk.bf16.mxu1 %vm1783_vm0, %v1782_v0  ;;  %1371 = vmatpush3.bf16.msra.mxu1 %v1485_v3 }
 0x363   :  { %1372 = vmatprep.subr.bf16.mxu1 %v1782_v0 }
 0x366   :  { %1373 = vmatpush3.bf16.msra.mxu1 %v1486_v4 }
 0x367   :  { %1374 = vmatprep.subr.bf16.mxu1 %v1782_v0 }
 0x36a   :  { %1375 = vmatpush3.bf16.msra.mxu1 %v1487_v5 }
 0x36b   :  { %1376 = vmatprep.subr.bf16.mxu1 %v1782_v0 }
 0x36e   :  { %1377 = vmatpush3.bf16.msra.mxu1 %v1488_v6 }
 0x36f   :  { %1378 = vmatprep.subr.bf16.mxu1 %v1782_v0 }
 0x372   :  { %1379 = vmatpush3.bf16.msra.mxu1 %v1489_v7 }
 0x373   :  { %1380 = vmatprep.subr.bf16.mxu1 %v1782_v0 }
 0x376   :  { %1381 = vmatpush3.bf16.msra.mxu1 %v1490_v8 }
 0x377   :  { %1382 = vmatprep.subr.bf16.mxu1 %v1782_v0 }
 0x37a   :  { %1383 = vmatpush3.bf16.msra.mxu1 %v1491_v17 }
 0x37b   :  { %1384 = vmatprep.subr.bf16.mxu1 %v1782_v0 }
 0x37e   :  { %1385 = vmatpush3.bf16.msra.mxu1 %v1492_v18 }
 0x37f   :  { %1410 = vmatprep.subr.bf16.mxu1 %v1782_v0 }
 0x434   :  { %v626_v10 = vpop.f32.mrb[4].mxu1 }
 0x435   :  { %v627_v11 = vadd.f32 %v1153_v9, %v626_v10  ;;  %v1348_v12 = vpop.f32.mrb[5].mxu1 }
 0x436   :  { %v629_v13 = vpop.f32.mrb[6].mxu1 }
 0x437   :  { %1509 = vtanh.f32 %v627_v11  ;;  %v1349_v14 = vpop.f32.mrb[7].mxu1 }
 0x441   :  { %v1510_v15 = vpop.eup %1509 }
 0x442   :  { %634 = vst [vmem:[#allocation17] sm:$0xff] %v1510_v15  ;;  %v633_v16 = vpack.c.bf16 %v1510_v15, %v1510_v15 }
 0x444   :  { %1367 = vmatmul.mubr.bf16.vlgmr.msra.gmra.mrb[8].mxu0 %v633_v16 }
 0x445   :  { %1406 = vmatprep.mubr.msk.bf16.mxu0 %vm1783_vm0, %v1782_v0  ;;  %1391 = vmatpush3.bf16.msra.mxu0 %v1493_v19 }
 0x446   :  { %1392 = vmatprep.subr.bf16.mxu0 %v1782_v0 }
 0x449   :  { %1393 = vmatpush3.bf16.msra.mxu0 %v1494_v20 }
 0x44a   :  { %1394 = vmatprep.subr.bf16.mxu0 %v1782_v0 }
 0x44d   :  { %1395 = vmatpush3.bf16.msra.mxu0 %v1495_v21 }
 0x44e   :  { %1396 = vmatprep.subr.bf16.mxu0 %v1782_v0 }
 0x451   :  { %1397 = vmatpush3.bf16.msra.mxu0 %v1496_v22 }
 0x452   :  { %1398 = vmatprep.subr.bf16.mxu0 %v1782_v0 }
 0x455   :  { %1399 = vmatpush3.bf16.msra.mxu0 %v1497_v23 }
 0x456   :  { %1400 = vmatprep.subr.bf16.mxu0 %v1782_v0 }
 0x459   :  { %1401 = vmatpush3.bf16.msra.mxu0 %v1498_v24 }
 0x45a   :  { %1402 = vmatprep.subr.bf16.mxu0 %v1782_v0 }
 0x45d   :  { %1403 = vmatpush3.bf16.msra.mxu0 %v1499_v33 }
 0x45e   :  { %1404 = vmatprep.subr.bf16.mxu0 %v1782_v0 }
 0x461   :  { %1405 = vmatpush3.bf16.msra.mxu0 %v1500_v34 }
 0x517   :  { %v740_v26 = vpop.f32.mrb[8].mxu0 }
 0x518   :  { %v741_v27 = vadd.f32 %v1162_v25, %v740_v26  ;;  %v1368_v28 = vpop.f32.mrb[9].mxu0 }
 0x519   :  { %v743_v29 = vpop.f32.mrb[10].mxu0 }
 0x51a   :  { %v746_v30 = vmax.f32 %v741_v27, 0.0  ;;  %v1369_v31 = vpop.f32.mrb[11].mxu0 }
 0x51c   :  { %v747_v32 = vpack.c.bf16 %v746_v30, %v746_v30 }
 0x51e   :  { %1387 = vmatmul.mubr.bf16.vlgmr.msra.gmra.mrb[8].mxu1 %v747_v32 }
 0x51f   :  { %1426 = vmatprep.mubr.msk.bf16.mxu1 %vm1783_vm0, %v1782_v0  ;;  %1411 = vmatpush3.bf16.msra.mxu1 %v1501_v35 }
 0x520   :  { %1412 = vmatprep.subr.bf16.mxu1 %v1782_v0 }
 0x523   :  { %1413 = vmatpush3.bf16.msra.mxu1 %v1502_v36 }
 0x524   :  { %1414 = vmatprep.subr.bf16.mxu1 %v1782_v0 }
 0x527   :  { %1415 = vmatpush3.bf16.msra.mxu1 %v1503_v37 }
 0x528   :  { %1416 = vmatprep.subr.bf16.mxu1 %v1782_v0 }
 0x52b   :  { %1417 = vmatpush3.bf16.msra.mxu1 %v1504_v38 }
 0x52c   :  { %1418 = vmatprep.subr.bf16.mxu1 %v1782_v0 }
 0x52f   :  { %1419 = vmatpush3.bf16.msra.mxu1 %v1505_v39 }
 0x530   :  { %1420 = vmatprep.subr.bf16.mxu1 %v1782_v0 }
 0x533   :  { %1421 = vmatpush3.bf16.msra.mxu1 %v1506_v40 }
 0x534   :  { %1422 = vmatprep.subr.bf16.mxu1 %v1782_v0 }
 0x537   :  { %1423 = vmatpush3.bf16.msra.mxu1 %v1507_v49 }
 0x538   :  { %1424 = vmatprep.subr.bf16.mxu1 %v1782_v0 }
 0x53b   :  { %1425 = vmatpush3.bf16.msra.mxu1 %v1508_v50 }
 0x5f1   :  { %v853_v42 = vpop.f32.mrb[8].mxu1 }
 0x5f2   :  { %v854_v43 = vadd.f32 %v1171_v41, %v853_v42  ;;  %v1388_v44 = vpop.f32.mrb[9].mxu1 }
 0x5f3   :  { %v856_v45 = vpop.f32.mrb[10].mxu1 }
 0x5f4   :  { %v859_v46 = vmax.f32 %v854_v43, 0.0  ;;  %v1389_v47 = vpop.f32.mrb[11].mxu1 }
 0x5f6   :  { %v860_v48 = vpack.c.bf16 %v859_v46, %v859_v46 }
 0x5f8   :  { %1407 = vmatmul.mubr.bf16.vlgmr.msra.gmra.mrb[12].mxu0 %v860_v48 }
 0x6cb   :  { %v966_v52 = vpop.f32.mrb[12].mxu0 }
 0x6cc   :  { %v967_v53 = vadd.f32 %v1180_v51, %v966_v52  ;;  %v1408_v54 = vpop.f32.mrb[13].mxu0 }
 0x6cd   :  { %v969_v55 = vpop.f32.mrb[14].mxu0 }
 0x6ce   :  { %v972_v56 = vmax.f32 %v967_v53, 0.0  ;;  %v1409_v57 = vpop.f32.mrb[15].mxu0 }
 0x6d0   :  { %v973_v58 = vpack.c.bf16 %v972_v56, %v972_v56 }
 0x6d2   :  { %1427 = vmatmul.mubr.bf16.vlgmr.msra.gmra.mrb[12].mxu1 %v973_v58 }
 0x6d3   :  { %1724 = shalt.err (!%p1721_p6)
}
 0x6d4   :  { %s1725_s27 = scalar_lea.hbm %s2158_s17, 128 }
 0x6d5   :  { %p1726_p7 = scmp.ne.s32.totalorder %s2158_s17, %s1725_s27  ;;  %p1729_p8 = scmp.lt.u32.totalorder %s1725_s27, %s2158_s17 }
 0x6d7   :  { %p1731_p9 = pnand %p1729_p8, %p1726_p7 }
 0x6d9   :  { %1734 = shalt.err (!%p1731_p9)
}
 0x6da   :  { %1102 = dma.vmem_to_hbm [thread:$0]  %s1100_s7, 128, %s2158_s17, [#allocation4]  }
 0x6db   :  { %s2171_s5 = sld [smem:[#allocation30_spill]]  ;;  %s1785_s15 = smov [#allocation18]  }
 0x6dc   :  { %s1109_s23 = sshll.u32 %s1785_s15, 4  ;;  %s1110_s23 = int_to_ptr.vmem [resolvable:$true] %s1109_s23 }
 0x6dd   :  { %s1735_s17 = scalar_lea.vmem %s1110_s23, 128  ;;  %p1740_p11 = scmp.lt.s32.totalorder %s1110_s23, %s1110_s23 }
 0x6de   :  { %p1736_p10 = scmp.ne.s32.totalorder %s1110_s23, %s1735_s17  ;;  %p1741_p12 = scmp.lt.s32.totalorder %s1735_s17, %s1735_s17 }
 0x6e0   :  { %p1742_p13 = por %p1741_p12, %p1740_p11 }
 0x6e1   :  { %v1189_v0 = vld [vmem:[%s2171_s5] ss:$0 sm:$0xff] }
 0x6e2   :  { %p1743_p0 = pnand %p1742_p13, %p1736_p10 }
 0x7a5   :  { %v1079_v59 = vpop.f32.mrb[12].mxu1 }
 0x7a6   :  { %v1080_v60 = vadd.f32 %v1189_v0, %v1079_v59  ;;  %v1428_v61 = vpop.f32.mrb[13].mxu1 }
 0x7a7   :  { %v1082_v62 = vpop.f32.mrb[14].mxu1 }
 0x7a8   :  { %v1085_v63 = vsub.f32 0.0, %v1080_v60  ;;  %v1429_v1 = vpop.f32.mrb[15].mxu1 }
 0x7aa   :  { %v1086_v2 = vmul.f32 1.442695, %v1085_v63 }
 0x7ac   :  { %1511 = vpow2.f32 %v1086_v2 }
 0x7b6   :  { %v1512_v3 = vpop.eup %1511 }
 0x7b7   :  { %v1088_v4 = vadd.f32 1.0, %v1512_v3 }
 0x7b9   :  { %1513 = vrcp.f32 %v1088_v4 }
 0x7c3   :  { %v1514_v5 = vpop.eup %1513 }
 0x7c4   :  { %v1090_v6 = vmax.f32 %v1514_v5, 0.0 }
 0x7c6   :  { %v1091_v7 = vmin.f32 %v1090_v6, 1.0 }
 0x7c8   :  { %1092 = vst [vmem:[#allocation18] sm:$0xff] %v1091_v7 }
 0x7c9   :  { %1746 = shalt.err (!%p1743_p0)
}
 0x7ca   :  { %s2172_s25 = sld [smem:[#allocation31_spill]] }
 0x7d0   :  { %s1747_s4 = scalar_lea.hbm %s2172_s25, 128 }
 0x7d1   :  { %p1748_p1 = scmp.ne.s32.totalorder %s2172_s25, %s1747_s4  ;;  %p1751_p2 = scmp.lt.u32.totalorder %s1747_s4, %s2172_s25 }
 0x7d3   :  { %p1753_p3 = pnand %p1751_p2, %p1748_p1 }
 0x7d5   :  { %1756 = shalt.err (!%p1753_p3)
}
 0x7d6   :  { %1112 = dma.vmem_to_hbm [thread:$0]  %s1110_s23, 128, %s2172_s25, [#allocation19]  }
 0x7d7   :  { %1767 = dma.done.wait [#allocation4], 128  }
 0x7d8   :  { %1768 = vsyncadd [#allocation4], 4294967168 }
 0x7d9   :  { %1769 = dma.done.wait [#allocation19], 128  }
 0x7da   :  { %1770 = vsyncadd [#allocation19], 4294967168 }
 0x7db   :  { %1119 = vsyncpa [#allocation3], 1 }
 0x7dc   :  { %1120 = vsyncpa [#allocation6], 1 }
 0x7dd   :  { %1121 = vsyncpa [#allocation9], 1 }
 0x7de   :  { %1122 = vsyncpa [#allocation12], 1 }
 0x7df   :  { %1123 = vsyncpa [#allocation15], 1 }
 0x7e0   :  { %1124 = vsyncpa [#allocation4], 1 }
 0x7e1   :  { %1125 = vsyncpa [#allocation19], 1 }

</bundles_post_ra>
